<compile_context>
chip_gen: v7x
topology: tpu7x:2x2x1
jax: 0.10.0
libtpu: 0.0.40
codegen_flags: <defaults>
</compile_context>

<pallas_src>
import jax
import jax.numpy as jnp
from jax.experimental import pallas as pl
from jax.experimental.pallas import tpu as pltpu

HIDDEN = 16


def _round_up(x, m):
    return ((x + m - 1) // m) * m


def _mlp_kernel(x_ref, w1_ref, b1_ref, w2_ref, b2_ref, w3_ref, b3_ref, o_ref):
    """3-layer MLP (Linear->ReLU->Linear->ReLU->Linear) on one batch tile."""
    x = x_ref[...]
    h1 = jnp.dot(x, w1_ref[...], preferred_element_type=jnp.float32) + b1_ref[...]
    h1 = jnp.maximum(h1, 0.0)
    h2 = jnp.dot(h1, w2_ref[...], preferred_element_type=jnp.float32) + b2_ref[...]
    h2 = jnp.maximum(h2, 0.0)
    out = jnp.dot(h2, w3_ref[...], preferred_element_type=jnp.float32) + b3_ref[...]
    o_ref[...] = out.astype(o_ref.dtype)


def _block_diag(w, g):
    """g copies of w (fi, fo) along the diagonal -> (g*fi, g*fo)."""
    fi, fo = w.shape
    eye = jnp.eye(g, dtype=w.dtype)
    t = eye[:, :, None, None] * w[None, None, :, :]          # (g, g, fi, fo)
    return t.transpose(0, 2, 1, 3).reshape(g * fi, g * fo)   # (g*fi, g*fo)


def _choose_fold(batch, in_dim, lane_fold):
    """Batch-fold factor g: fold g rows into one lane-dense row when possible."""
    if lane_fold is not None:
        g = int(lane_fold)
    elif 0 < in_dim < 128 and 128 % in_dim == 0:
        g = 128 // in_dim           # lane-dense input (g*in_dim == 128)
    else:
        g = 1
    if g <= 1 or batch % g != 0:
        return 1
    return g


def adl_double_dqn_forward(state, params, *, batch_tile=None, lane_fold=None,
                           out_dtype=jnp.float32, hidden=HIDDEN):
    """ADLDoubleDQN forward pass (Q-values) via a Pallas TPU kernel.

    state : (B, input_dim) float32
    params: dict with w1 (in,16), b1 (1,16), w2 (16,16), b2 (1,16),
            w3 (16,out), b3 (1,out) -- already in (in, out) layout.
    batch_tile: rows of the (possibly folded) state per grid step.  Default
            auto-targets ~4 MiB of state per step (8192-32768 rows).
    lane_fold:  explicit batch-fold factor (see module docstring).  Default
            picks 128 // input_dim when it divides 128 and B; pass 8-32 on
            v6e/v7x for a fully lane-dense output.
    out_dtype:  Q-value dtype (jnp.bfloat16 halves output write traffic).
    """
    del hidden  # implied by the weight shapes
    B, in_dim = state.shape
    out_dim = params["w3"].shape[1]

    w1, b1 = params["w1"], params["b1"]
    w2, b2 = params["w2"], params["b2"]
    w3, b3 = params["w3"], params["b3"]

    g = _choose_fold(B, in_dim, lane_fold)
    if g > 1:
        # Bytes-identical row-major view; block-diagonal weights keep the math
        # exact while making every matmul K dim >= 128 (lane-dense loads).
        x = state.reshape(B // g, g * in_dim)
        w1, w2, w3 = (_block_diag(w, g) for w in (w1, w2, w3))
        b1, b2, b3 = (jnp.tile(b, (1, g)) for b in (b1, b2, b3))
    else:
        x = state

    rows, feat_in = x.shape
    feat_out = g * out_dim

    # --- Tile sizing -------------------------------------------------------
    # Target ~4 MiB of state per grid step (amortizes the ~0.35us fixed
    # per-step pipeline overhead to <10%), multiple of 8 sublanes.
    if batch_tile is None:
        tb = max(8, ((4 << 20) // (feat_in * 4)) // 8 * 8)
    else:
        tb = max(8, (batch_tile // 8) * 8)
    # Keep >=2 grid steps whenever the batch allows it so the "parallel" batch
    # axis can actually split across v7x's two TensorCores.
    tb = min(tb, max(8, _round_up(-(-rows // 2), 8)))

    grid = (pl.cdiv(rows, tb),)   # ragged tail handled by Pallas partial block

    def _invariant(shape):
        return pl.BlockSpec(shape, lambda i: (0, 0))

    out = pl.pallas_call(
        _mlp_kernel,
        out_shape=jax.ShapeDtypeStruct((rows, feat_out), out_dtype),
        grid=grid,
        in_specs=[
            # Batch-tiled state stream (dominant HBM traffic, double-buffered).
            pl.BlockSpec((tb, feat_in), lambda i: (i, 0)),
            # Grid-invariant weights / biases (fetched once, kept in VMEM).
            _invariant(w1.shape), _invariant(b1.shape),
            _invariant(w2.shape), _invariant(b2.shape),
            _invariant(w3.shape), _invariant(b3.shape),
        ],
        out_specs=pl.BlockSpec((tb, feat_out), lambda i: (i, 0)),
        compiler_params=pltpu.CompilerParams(
            dimension_semantics=("parallel",),       # megacore-shardable
            vmem_limit_bytes=32 * 1024 * 1024,       # safe on v5e/v6e/v7x
        ),
    )(x, w1, b1, w2, b2, w3, b3)

    # Folded output (B//g, g*out) -> (B, out) is a free bytes-identical view.
    return out.reshape(B, out_dim) if g > 1 else out


def init_params(key, input_dim, output_dim, hidden=HIDDEN):
    """Deterministic synthetic init (mimics nn.Linear's uniform fan-in init)."""
    keys = jax.random.split(key, 6)

    def linear(kw, kb, fan_in, fan_out):
        bound = 1.0 / jnp.sqrt(fan_in)
        w = jax.random.uniform(kw, (fan_in, fan_out), jnp.float32, -bound, bound)
        b = jax.random.uniform(kb, (1, fan_out), jnp.float32, -bound, bound)
        return w, b

    w1, b1 = linear(keys[0], keys[1], input_dim, hidden)
    w2, b2 = linear(keys[2], keys[3], hidden, hidden)
    w3, b3 = linear(keys[4], keys[5], hidden, output_dim)
    return {"w1": w1, "b1": b1, "w2": w2, "b2": b2, "w3": w3, "b3": b3}


def reference_forward(state, p):
    h1 = jnp.maximum(state @ p["w1"] + p["b1"], 0.0)
    h2 = jnp.maximum(h1 @ p["w2"] + p["b2"], 0.0)
    return h2 @ p["w3"] + p["b3"]


# TODO(synk): torch.optim.Adam (self.network_optimizer) is training-only state
# and has no forward-pass equivalent; not implemented.

if __name__ == "__main__":
    key = jax.random.PRNGKey(0)
    k_params, k_s1, k_s2 = jax.random.split(key, 3)

    input_dim = 32    # flat observation vector
    output_dim = 4    # number of discrete actions
    params = init_params(k_params, input_dim, output_dim)

    # Case 1: batch divisible by the lane-fold factor (128 // 32 = 4)
    #         -> lane-dense folded path, multi-step grid.
    s1 = jax.random.normal(k_s1, (64, input_dim), dtype=jnp.float32)
    q1 = jax.block_until_ready(adl_double_dqn_forward(s1, params))
    assert q1.shape == (64, output_dim)
    assert jnp.allclose(q1, reference_forward(s1, params), atol=1e-4, rtol=1e-4), \
        "folded-path mismatch vs reference"

    # Case 2: ragged batch (not a multiple of 8 or 4) -> plain path with a
    #         Pallas-handled partial tail block (no wrapper-side padding).
    s2 = jax.random.normal(k_s2, (10, input_dim), dtype=jnp.float32)
    q2 = jax.block_until_ready(adl_double_dqn_forward(s2, params))
    assert q2.shape == (10, output_dim)
    assert jnp.allclose(q2, reference_forward(s2, params), atol=1e-4, rtol=1e-4), \
        "ragged-path mismatch vs reference"

    print("KERNEL_OK")
</pallas_src>

<mosaic_0001>
module attributes {stable_mosaic.version = 11 : i64} {
  func.func @_mlp_kernel(%arg0: i32, %arg1: memref<8x128xf32, #tpu.memory_space<vmem>>, %arg2: memref<128x64xf32, #tpu.memory_space<vmem>>, %arg3: memref<1x64xf32, #tpu.memory_space<vmem>>, %arg4: memref<64x64xf32, #tpu.memory_space<vmem>>, %arg5: memref<1x64xf32, #tpu.memory_space<vmem>>, %arg6: memref<64x16xf32, #tpu.memory_space<vmem>>, %arg7: memref<1x16xf32, #tpu.memory_space<vmem>>, %arg8: memref<8x16xf32, #tpu.memory_space<vmem>>) attributes {dimension_semantics = [#tpu.dimension_semantics<parallel>], iteration_bounds = array<i64: 2>, scalar_prefetch = 0 : i64, scratch_operands = 0 : i64, tpu.core_type = #tpu.core_type<tc>, window_params = [{transform_indices = @transform_0, window_bounds = array<i64: 8, 128>}, {pipeline_mode = #tpu.pipeline_mode<synchronous>, transform_indices = @transform_1, window_bounds = array<i64: 128, 64>}, {pipeline_mode = #tpu.pipeline_mode<synchronous>, transform_indices = @transform_2, window_bounds = array<i64: 1, 64>}, {pipeline_mode = #tpu.pipeline_mode<synchronous>, transform_indices = @transform_3, window_bounds = array<i64: 64, 64>}, {pipeline_mode = #tpu.pipeline_mode<synchronous>, transform_indices = @transform_4, window_bounds = array<i64: 1, 64>}, {pipeline_mode = #tpu.pipeline_mode<synchronous>, transform_indices = @transform_5, window_bounds = array<i64: 64, 16>}, {pipeline_mode = #tpu.pipeline_mode<synchronous>, transform_indices = @transform_6, window_bounds = array<i64: 1, 16>}, {transform_indices = @transform_7, window_bounds = array<i64: 8, 16>}]} {
    %c0 = arith.constant 0 : index
    %c0_0 = arith.constant 0 : index
    %0 = vector.load %arg1[%c0, %c0_0] : memref<8x128xf32, #tpu.memory_space<vmem>>, vector<8x128xf32>
    %c0_1 = arith.constant 0 : index
    %c0_2 = arith.constant 0 : index
    %1 = vector.load %arg2[%c0_1, %c0_2] : memref<128x64xf32, #tpu.memory_space<vmem>>, vector<128x64xf32>
    %cst = arith.constant dense<0.000000e+00> : vector<8x64xf32>
    %2 = tpu.matmul %0, %1, %cst {dimension_numbers = #tpu.dot_dimension_numbers<[1], [0], [0], [1], [0, 0, 1, 1], [], []>} : vector<8x128xf32>, vector<128x64xf32>, vector<8x64xf32> -> vector<8x64xf32>
    %c0_3 = arith.constant 0 : index
    %c0_4 = arith.constant 0 : index
    %3 = vector.load %arg3[%c0_3, %c0_4] : memref<1x64xf32, #tpu.memory_space<vmem>>, vector<1x64xf32>
    %4 = vector.broadcast %3 : vector<1x64xf32> to vector<8x64xf32>
    %5 = arith.addf %2, %4 : vector<8x64xf32>
    %cst_5 = arith.constant 0.000000e+00 : f32
    %6 = vector.broadcast %cst_5 : f32 to vector<8x64xf32>
    %7 = arith.maximumf %5, %6 : vector<8x64xf32>
    %c0_6 = arith.constant 0 : index
    %c0_7 = arith.constant 0 : index
    %8 = vector.load %arg4[%c0_6, %c0_7] : memref<64x64xf32, #tpu.memory_space<vmem>>, vector<64x64xf32>
    %cst_8 = arith.constant dense<0.000000e+00> : vector<8x64xf32>
    %9 = tpu.matmul %7, %8, %cst_8 {dimension_numbers = #tpu.dot_dimension_numbers<[1], [0], [0], [1], [0, 0, 1, 1], [], []>} : vector<8x64xf32>, vector<64x64xf32>, vector<8x64xf32> -> vector<8x64xf32>
    %c0_9 = arith.constant 0 : index
    %c0_10 = arith.constant 0 : index
    %10 = vector.load %arg5[%c0_9, %c0_10] : memref<1x64xf32, #tpu.memory_space<vmem>>, vector<1x64xf32>
    %11 = vector.broadcast %10 : vector<1x64xf32> to vector<8x64xf32>
    %12 = arith.addf %9, %11 : vector<8x64xf32>
    %cst_11 = arith.constant 0.000000e+00 : f32
    %13 = vector.broadcast %cst_11 : f32 to vector<8x64xf32>
    %14 = arith.maximumf %12, %13 : vector<8x64xf32>
    %c0_12 = arith.constant 0 : index
    %c0_13 = arith.constant 0 : index
    %15 = vector.load %arg6[%c0_12, %c0_13] : memref<64x16xf32, #tpu.memory_space<vmem>>, vector<64x16xf32>
    %cst_14 = arith.constant dense<0.000000e+00> : vector<8x16xf32>
    %16 = tpu.matmul %14, %15, %cst_14 {dimension_numbers = #tpu.dot_dimension_numbers<[1], [0], [0], [1], [0, 0, 1, 1], [], []>} : vector<8x64xf32>, vector<64x16xf32>, vector<8x16xf32> -> vector<8x16xf32>
    %c0_15 = arith.constant 0 : index
    %c0_16 = arith.constant 0 : index
    %17 = vector.load %arg7[%c0_15, %c0_16] : memref<1x16xf32, #tpu.memory_space<vmem>>, vector<1x16xf32>
    %18 = vector.broadcast %17 : vector<1x16xf32> to vector<8x16xf32>
    %19 = arith.addf %16, %18 : vector<8x16xf32>
    %c0_17 = arith.constant 0 : index
    %c0_18 = arith.constant 0 : index
    %20 = vector.load %arg8[%c0_17, %c0_18] : memref<8x16xf32, #tpu.memory_space<vmem>>, vector<8x16xf32>
    tpu.vector_store %arg8[%c0_17, %c0_18], %19 {strides = array<i32>} : memref<8x16xf32, #tpu.memory_space<vmem>>, vector<8x16xf32>,
    return
  }
  func.func @transform_0(%arg0: i32) -> (i32, i32) {
    %c0_i32 = arith.constant 0 : i32
    %c0_i32_0 = arith.constant 0 : i32
    return %arg0, %c0_i32 : i32, i32
  }
  func.func @transform_1(%arg0: i32) -> (i32, i32) {
    %c0_i32 = arith.constant 0 : i32
    %c0_i32_0 = arith.constant 0 : i32
    %c0_i32_1 = arith.constant 0 : i32
    return %c0_i32, %c0_i32_0 : i32, i32
  }
  func.func @transform_2(%arg0: i32) -> (i32, i32) {
    %c0_i32 = arith.constant 0 : i32
    %c0_i32_0 = arith.constant 0 : i32
    %c0_i32_1 = arith.constant 0 : i32
    return %c0_i32, %c0_i32_0 : i32, i32
  }
  func.func @transform_3(%arg0: i32) -> (i32, i32) {
    %c0_i32 = arith.constant 0 : i32
    %c0_i32_0 = arith.constant 0 : i32
    %c0_i32_1 = arith.constant 0 : i32
    return %c0_i32, %c0_i32_0 : i32, i32
  }
  func.func @transform_4(%arg0: i32) -> (i32, i32) {
    %c0_i32 = arith.constant 0 : i32
    %c0_i32_0 = arith.constant 0 : i32
    %c0_i32_1 = arith.constant 0 : i32
    return %c0_i32, %c0_i32_0 : i32, i32
  }
  func.func @transform_5(%arg0: i32) -> (i32, i32) {
    %c0_i32 = arith.constant 0 : i32
    %c0_i32_0 = arith.constant 0 : i32
    %c0_i32_1 = arith.constant 0 : i32
    return %c0_i32, %c0_i32_0 : i32, i32
  }
  func.func @transform_6(%arg0: i32) -> (i32, i32) {
    %c0_i32 = arith.constant 0 : i32
    %c0_i32_0 = arith.constant 0 : i32
    %c0_i32_1 = arith.constant 0 : i32
    return %c0_i32, %c0_i32_0 : i32, i32
  }
  func.func @transform_7(%arg0: i32) -> (i32, i32) {
    %c0_i32 = arith.constant 0 : i32
    %c0_i32_0 = arith.constant 0 : i32
    return %arg0, %c0_i32 : i32, i32
  }
}

</mosaic_0001>

<bundles_post_ra>
// kernel: tpu_custom_call.1
= control target key start
LH: loop header
LB: loop body
LE: loop exit
PB: predicated region body
PF: predicated region fallthrough
CT: control target
= control target key end

     0   :  { %12 = vsyncpa [#allocation3], 0  ;;  %s1172_s0 = inlined_call_operand.vmem [shape: f32[16,128], index: 0, kind: input, shape index: {}]   ;;  %s1173_s1 = inlined_call_operand.vmem [shape: f32[128,64], index: 1, kind: input, shape index: {}]   ;;  %s1174_s2 = inlined_call_operand.vmem [shape: f32[1,64], index: 2, kind: input, shape index: {}]   ;;  %s1175_s3 = inlined_call_operand.vmem [shape: f32[64,64], index: 3, kind: input, shape index: {}]   ;;  %s1176_s4 = inlined_call_operand.vmem [shape: f32[1,64], index: 4, kind: input, shape index: {}]   ;;  %s1177_s5 = inlined_call_operand.vmem [shape: f32[64,16], index: 5, kind: input, shape index: {}]   ;;  %s1178_s6 = inlined_call_operand.vmem [shape: f32[1,16], index: 6, kind: input, shape index: {}]   ;;  %s1179_s7 = inlined_call_operand.hbm [shape: f32[16,16], index: 7, kind: output, shape index: {}]  }
   0x1   :  { %14 = vsyncpa [#allocation3 + $0x1], 0  ;;  %s943_s24 = smov 0   ;;  %s945_s25 = smov 0  }
   0x2   :  { %s947_s26 = smov 0   ;;  %s949_s27 = smov 0  }
   0x3 LB: > { %s964_s28 = sadd.s32 4294967295, %s897_s27   ;;  %s622_s29 = sadd.s32 4294967294, %s897_s27   ;;  %s897_s27 = sphi %s949_s27, %s1185_s27   ;;  %s893_s26 = sphi %s947_s26, %s1184_s26   ;;  %s889_s25 = sphi %s945_s25, %s1183_s25   ;;  %s885_s24 = sphi %s943_s24, %s1182_s24  }
   0x4   : > { %s968_s30 = sadd.s32 1, %s897_s27   ;;  %s179_s8 = sadd.s32 1, %s893_s26 }
   0x5   : > { %s176_s9 = ssub.s32 %s897_s27, %s968_s30  ;;  %p189_p0 = scmp.ne.s32.totalorder %s893_s26, %s889_s25 }
   0x6   : > { %p177_p1 = scmp.eq.s32.totalorder %s176_s9, 0  ;;  %p190_p2 = scmp.eq.s32.totalorder %s964_s28, 1 }
   0x7   : > { %p195_p3 = scmp.ne.s32.totalorder %s889_s25, %s885_s24  ;;  %p196_p4 = scmp.eq.s32.totalorder %s622_s29, 1 }
   0x8   : > { %s979_s10 = scalar_select %p177_p1, %s893_s26, %s179_s8  }
   0x9   : > { %p981_p5 = por %p190_p2, %p189_p0  ;;  %p985_p6 = por %p196_p4, %p195_p3 }
   0xa   : > { %p625_p7 = scmp.ge.s32.totalorder %s897_s27, 1  ;;  %p239_p8 = scmp.lt.s32.totalorder %s897_s27, 3 }
   0xc   : > { %p240_p9 = pnand %p625_p7, %p239_p8 }
   0xd   : > { %v275_v0 = vld [vmem:[%s1173_s1] sm:$0xff] (!%p240_p9)  ;;  %v276_v1 = vld [vmem:[%s1173_s1 + $0x8] sm:$0xff] (!%p240_p9)  ;;  %v277_v2 = vld [vmem:[%s1173_s1 + $0x10] sm:$0xff] (!%p240_p9)  ;;  %v899_v3 = vmov (!%p240_p9), 0.0|0.0   ;;  %vm900_vm0 = vmmov (!%p240_p9), 0   ;;  %v901_v6 = vmov (!%p240_p9), 0.0  }
   0xe   : > { %243 = sbr.rel (%p240_p9) target bundleno = 707 (0x2c3), region = 48  ;;  %745 = vmatprep.subr.bf16.mxu0 (!%p240_p9), %v899_v3  ;;  %v746_v4 = vpack.c.bf16 (!%p240_p9), %v276_v1, %v275_v0  ;;  %v278_v5 = vld [vmem:[%s1173_s1 + $0x18] sm:$0xff] (!%p240_p9)  ;;  %704 = vmatprep.mubr.msk.f32.mxu0 (!%p240_p9), %vm900_vm0, %v901_v6  ;;  %v279_v8 = vld [vmem:[%s1173_s1 + $0x20] sm:$0xff] (!%p240_p9)  ;;  %v280_v9 = vld [vmem:[%s1173_s1 + $0x28] sm:$0xff] (!%p240_p9)  ;;  %p270_p10 = scmp.lt.s32.totalorder (!%p240_p9), %s964_s28, 1  ;;  %vm384_vm1 = vcmask (!%p240_p9), 523264  }
   0xf   : > { %769 = vmatprep.subr.bf16.mxu1 (!%p240_p9), %v899_v3  ;;  %723 = vmatprep.mubr.msk.f32.mxu1 (!%p240_p9), %vm900_vm0, %v901_v6  ;;  %v749_v7 = vpack.c.bf16 (!%p240_p9), %v278_v5, %v277_v2  ;;  %v369_v10 = vld [vmem:[%s1175_s3] sm:$0xff] (!%p240_p9)  ;;  %v370_v11 = vld [vmem:[%s1175_s3 + $0x8] sm:$0xff] (!%p240_p9)  ;;  %v371_v13 = vld [vmem:[%s1175_s3 + $0x10] sm:$0xff] (!%p240_p9)  ;;  %v752_v15 = vpack.c.bf16 (!%p240_p9), %v280_v9, %v279_v8  ;;  %s634_s20 = sshll.u32 (!%p240_p9), %s964_s28, 7  ;;  %vm547_vm2 = vcmask (!%p240_p9), 130048  }
  0x10   : > { %747 = vmatpush3.bf16.msra.mxu0 (!%p240_p9), %v746_v4  ;;  %v770_v12 = vpack.c.bf16 (!%p240_p9), %v370_v11, %v369_v10  ;;  %v372_v14 = vld [vmem:[%s1175_s3 + $0x18] sm:$0xff] (!%p240_p9)  ;;  %v281_v16 = vld [vmem:[%s1173_s1 + $0x30] sm:$0xff] (!%p240_p9)  ;;  %v373_v19 = vld [vmem:[%s1175_s3 + $0x20] sm:$0xff] (!%p240_p9) }
  0x11   : > { %748 = vmatprep.subr.bf16.mxu0 (!%p240_p9), %v899_v3  ;;  %v282_v17 = vld [vmem:[%s1173_s1 + $0x38] sm:$0xff] (!%p240_p9)  ;;  %v773_v18 = vpack.c.bf16 (!%p240_p9), %v372_v14, %v371_v13  ;;  %v374_v20 = vld [vmem:[%s1175_s3 + $0x28] sm:$0xff] (!%p240_p9)  ;;  %v283_v22 = vld [vmem:[%s1173_s1 + $0x40] sm:$0xff] (!%p240_p9) }
  0x12   : > { %771 = vmatpush3.bf16.msra.mxu1 (!%p240_p9), %v770_v12  ;;  %v755_v21 = vpack.c.bf16 (!%p240_p9), %v282_v17, %v281_v16  ;;  %v284_v23 = vld [vmem:[%s1173_s1 + $0x48] sm:$0xff] (!%p240_p9)  ;;  %v776_v24 = vpack.c.bf16 (!%p240_p9), %v374_v20, %v373_v19  ;;  %v285_v26 = vld [vmem:[%s1173_s1 + $0x50] sm:$0xff] (!%p240_p9)  ;;  %v286_v27 = vld [vmem:[%s1173_s1 + $0x58] sm:$0xff] (!%p240_p9) }
  0x13   : > { %772 = vmatprep.subr.bf16.mxu1 (!%p240_p9), %v899_v3  ;;  %v758_v25 = vpack.c.bf16 (!%p240_p9), %v284_v23, %v283_v22  ;;  %v761_v28 = vpack.c.bf16 (!%p240_p9), %v286_v27, %v285_v26  ;;  %v287_v29 = vld [vmem:[%s1173_s1 + $0x60] sm:$0xff] (!%p240_p9)  ;;  %v288_v30 = vld [vmem:[%s1173_s1 + $0x68] sm:$0xff] (!%p240_p9)  ;;  %v289_v32 = vld [vmem:[%s1173_s1 + $0x70] sm:$0xff] (!%p240_p9) }
  0x14   : > { %750 = vmatpush3.bf16.msra.mxu0 (!%p240_p9), %v749_v7  ;;  %v764_v31 = vpack.c.bf16 (!%p240_p9), %v288_v30, %v287_v29  ;;  %v290_v33 = vld [vmem:[%s1173_s1 + $0x78] sm:$0xff] (!%p240_p9)  ;;  %v375_v36 = vld [vmem:[%s1175_s3 + $0x30] sm:$0xff] (!%p240_p9)  ;;  %v628_v39 = vld [vmem:[%s1174_s2] ss:$0 sm:$0xff] (!%p240_p9) }
  0x15   : > { %751 = vmatprep.subr.bf16.mxu0 %v899_v3  ;;  %s271_s8 = scalar_select %p270_p10, %s964_s28, 1  ;;  %v767_v34 = vpack.c.bf16 %v290_v33, %v289_v32  ;;  %v376_v37 = vld [vmem:[%s1175_s3 + $0x38] sm:$0xff]  ;;  %v459_v40 = vld [vmem:[%s1177_s5] sm:$0xff]  ;;  %v460_v41 = vld [vmem:[%s1177_s5 + $0x8] sm:$0xff] }
  0x16   : > { %774 = vmatpush3.bf16.msra.mxu1 %v773_v18  ;;  %v779_v38 = vpack.c.bf16 %v376_v37, %v375_v36  ;;  %v782_v45 = vpack.c.bf16 %v460_v41, %v459_v40  ;;  %v461_v47 = vld [vmem:[%s1177_s5 + $0x10] sm:$0xff]  ;;  %v462_v48 = vld [vmem:[%s1177_s5 + $0x18] sm:$0xff]  ;;  %v463_v50 = vld [vmem:[%s1177_s5 + $0x20] sm:$0xff]  ;;  %s902_s28 = smov [#allocation2]  }
  0x17   : > { %775 = vmatprep.subr.bf16.mxu1 %v899_v3  ;;  %s627_s16 = sshll.u32 %s271_s8, 3  ;;  %v785_v49 = vpack.c.bf16 %v462_v48, %v461_v47  ;;  %v464_v51 = vld [vmem:[%s1177_s5 + $0x28] sm:$0xff]  ;;  %v465_v53 = vld [vmem:[%s1177_s5 + $0x30] sm:$0xff]  ;;  %v466_v54 = vld [vmem:[%s1177_s5 + $0x38] sm:$0xff]  ;;  %s1130_s8 = scalar_lea.hbm %s1179_s7, %s634_s20 }
  0x18   : > { %753 = vmatpush3.bf16.msra.mxu0 %v752_v15  ;;  %s273_s19 = scalar_lea.vmem %s1172_s0, %s627_s16  ;;  %v788_v52 = vpack.c.bf16 %v464_v51, %v463_v50  ;;  %v791_v55 = vpack.c.bf16 %v466_v54, %v465_v53  ;;  %v629_v56 = vld [vmem:[%s1176_s4] ss:$0 sm:$0xff]  ;;  %s267_s16 = sand.u32 1, %s889_s25  }
  0x19   : > { %754 = vmatprep.subr.bf16.mxu0 %v899_v3  ;;  %v274_v35 = vld [vmem:[%s273_s19] sm:$0xff]  ;;  %s626_s17 = sshll.u32 %s267_s16, 3  ;;  %s550_s9 = scalar_lea.sflag [#allocation3], %s267_s16 }
  0x1a   : > { %777 = vmatpush3.bf16.msra.mxu1 %v776_v24  ;;  %v631_v61 = vld [vmem:[%s1178_s6] ss:$0 sm:$0xff]  ;;  %s269_s21 = scalar_lea.vmem [#allocation2], %s626_s17  ;;  %s839_s14 = sshll.u32 %s902_s28, 4  ;;  %s840_s14 = int_to_ptr.vmem [resolvable:$false] %s839_s14 }
  0x1b   : > { %778 = vmatprep.subr.bf16.mxu1 %v899_v3  ;;  %s563_s22 = sshll.u32 %s269_s21, 4  ;;  %s841_s15 = scalar_lea.vmem %s840_s14, 256  ;;  %s1132_s22 = int_to_ptr.vmem [resolvable:$true] %s563_s22 }
  0x1c   : > { %756 = vmatpush3.bf16.msra.mxu0 %v755_v21  ;;  %s835_s13 = scalar_lea.vmem %s1132_s22, 128  ;;  %p842_p0 = scmp.lt.s32.totalorder %s1132_s22, %s840_s14 }
  0x1d   : > { %757 = vmatprep.subr.bf16.mxu0 %v899_v3  ;;  %p836_p11 = scmp.ne.s32.totalorder %s1132_s22, %s835_s13  ;;  %p843_p1 = scmp.lt.s32.totalorder %s841_s15, %s835_s13 }
  0x1e   : > { %780 = vmatpush3.bf16.msra.mxu1 %v779_v38 }
  0x1f   : > { %781 = vmatprep.subr.bf16.mxu1 %v899_v3  ;;  %p837_p12 = pnand %p836_p11, %p981_p5  ;;  %p844_p2 = por %p843_p1, %p842_p0 }
  0x20   : > { %759 = vmatpush3.bf16.msra.mxu0 %v758_v25 }
  0x21   : > { %760 = vmatprep.subr.bf16.mxu0 %v899_v3  ;;  %p838_p13 = pneg %p837_p12 }
  0x23   : > { %p845_p3 = pnand %p844_p2, %p838_p13 }
  0x24   : > { %762 = vmatpush3.bf16.msra.mxu0 %v761_v28 }
  0x25   : > { %763 = vmatprep.subr.bf16.mxu0 %v899_v3 }
  0x28   : > { %765 = vmatpush3.bf16.msra.mxu0 %v764_v31 }
  0x29   : > { %766 = vmatprep.subr.bf16.mxu0 %v899_v3 }
  0x2c   : > { %768 = vmatpush3.bf16.msra.mxu0 %v767_v34 }
  0x2f   : > { %705 = vmatmul.mubr.f32.vlgmr.msra.gmra.mrb[0].mxu0 %v274_v35 }
 0x102   : > { %v364_v42 = vpop.f32.mrb[0].mxu0 }
 0x103   : > { %v365_v43 = vadd.f32 %v628_v39, %v364_v42  ;;  %v706_v44 = vpop.f32.mrb[1].mxu0 }
 0x105   : > { %v368_v46 = vmax.f32 %v365_v43, 0.0 }
 0x107   : > { %724 = vmatmul.mubr.msk.f32.vlgmr.msra.gmra.mrb[0].mxu1 %vm384_vm1, %v368_v46 }
 0x108   : > { %783 = vmatpush3.bf16.msra.mxu1 %v782_v45  ;;  %742 = vmatprep.mubr.msk.f32.mxu1 %vm900_vm0, %v901_v6 }
 0x109   : > { %784 = vmatprep.subr.bf16.mxu1 %v899_v3 }
 0x10c   : > { %786 = vmatpush3.bf16.msra.mxu1 %v785_v49 }
 0x10d   : > { %787 = vmatprep.subr.bf16.mxu1 %v899_v3 }
 0x110   : > { %789 = vmatpush3.bf16.msra.mxu1 %v788_v52 }
 0x111   : > { %790 = vmatprep.subr.bf16.mxu1 %v899_v3 }
 0x114   : > { %792 = vmatpush3.bf16.msra.mxu1 %v791_v55 }
 0x1da   : > { %v454_v57 = vpop.f32.mrb[0].mxu1 }
 0x1db   : > { %v455_v58 = vadd.f32 %v629_v56, %v454_v57  ;;  %v725_v59 = vpop.f32.mrb[1].mxu1 }
 0x1dd   : > { %v458_v60 = vmax.f32 %v455_v58, 0.0 }
 0x1df   : > { %743 = vmatmul.mubr.msk.f32.vlgmr.msra.gmra.mrb[2].mxu1 %vm384_vm1, %v458_v60 }
 0x2b2   : > { %v543_v62 = vpop.f32.mrb[2].mxu1 }
 0x2b3   : > { %v544_v63 = vadd.f32 %v631_v61, %v543_v62  ;;  %v744_v0 = vpop.f32.mrb[3].mxu1 }
 0x2b5   : > { %548 = vst.msk [vmem:[%s269_s21] sm:$0xff] %vm547_vm2, %v544_v63 }
 0x2b6   : > { %848 = shalt.err (!%p845_p3)
}
 0x2b7   : > { %s849_s16 = scalar_lea.hbm %s1130_s8, 128  ;;  %s853_s19 = scalar_lea.hbm %s1179_s7, 256 }
 0x2b8   : > { %p850_p4 = scmp.ne.s32.totalorder %s1130_s8, %s849_s16  ;;  %p854_p9 = scmp.lt.u32.totalorder %s1130_s8, %s1179_s7 }
 0x2b9   : > { %p855_p10 = scmp.lt.u32.totalorder %s853_s19, %s849_s16  ;;  %p857_p12 = scmp.lt.u32.totalorder %s849_s16, %s1130_s8 }
 0x2ba   : > { %p851_p7 = pnand %p850_p4, %p981_p5 }
 0x2bb   : > { %p856_p11 = por %p855_p10, %p854_p9 }
 0x2bc   : > { %p852_p8 = pneg %p851_p7 }
 0x2bd   : > { %p858_p13 = por %p857_p12, %p856_p11 }
 0x2bf   : > { %p859_p0 = pnand %p858_p13, %p852_p8 }
 0x2c1   : > { %862 = shalt.err (!%p859_p0)
}
 0x2c2   : > { %793 = dma.vmem_to_hbm [thread:$0]  (%p981_p5), %s1132_s22, 128, %s1130_s8, %s550_s9  }
 0x2c3 PF: > { %p799_p1 = scmp.ge.s32.totalorder %s897_s27, 2  ;;  %s575_s23 = sand.u32 1, %s885_s24  }
 0x2c4   : > { %s576_s29 = scalar_lea.sflag [#allocation3], %s575_s23 }
 0x2c5   : > { %p796_p2 = pnand %p799_p1, %p985_p6 }
 0x2c7   : > { %880 = dma.done.wait (!%p796_p2), %s576_s29, 128  }
 0x2c8   : > { %882 = vsyncadd (!%p796_p2), %s576_s29, 4294967168  ;;  %p17_p3 = scmp.ge.s32.totalorder %s968_s30, 4   ;;  %s1182_s24 = smov %s889_s25 }
 0x2c9   : > { %s1183_s25 = smov %s893_s26  ;;  %s1184_s26 = smov %s979_s10 }
 0x2ca   : > { %s1185_s27 = smov %s968_s30  ;;  %19 = sbr.rel (!%p17_p3) target bundleno = 3 (0x3), region = 83 }
 0x2d1   :  { %581 = vsyncpa [#allocation3], 1 }
 0x2d2   :  { %583 = vsyncpa [#allocation3 + $0x1], 1 }

</bundles_post_ra>
